<compile_context>
chip_gen: v7x
topology: tpu7x:2x2x1
jax: 0.10.0
libtpu: 0.0.40
codegen_flags: <defaults>
</compile_context>

<pallas_src>
import functools

import jax
import jax.numpy as jnp
from jax.experimental import pallas as pl
from jax.experimental.pallas import tpu as pltpu


def _round_up(x, m):
    return (x + m - 1) // m * m


# ----------------------------------------------------------------------------
# Kernel 1: router gate (f32 logits) + one-shot bf16 copy of x.
# ----------------------------------------------------------------------------
def _gate_kernel(x_ref, gw_ref, logits_ref, xbf_ref):
    x = x_ref[...]
    logits_ref[...] = jnp.dot(x.astype(jnp.float32), gw_ref[...],
                              preferred_element_type=jnp.float32)
    xbf_ref[...] = x.astype(jnp.bfloat16)


def router_gate(x, gate_w, t_tile):
    T, H = x.shape
    E = gate_w.shape[1]
    return pl.pallas_call(
        _gate_kernel,
        out_shape=(jax.ShapeDtypeStruct((T, E), jnp.float32),
                   jax.ShapeDtypeStruct((T, H), jnp.bfloat16)),
        grid=(T // t_tile,),
        in_specs=[pl.BlockSpec((t_tile, H), lambda t: (t, 0)),
                  pl.BlockSpec((H, E), lambda t: (0, 0))],
        out_specs=[pl.BlockSpec((t_tile, E), lambda t: (t, 0)),
                   pl.BlockSpec((t_tile, H), lambda t: (t, 0))],
        compiler_params=pltpu.CompilerParams(
            dimension_semantics=("parallel",)),
    )(x, gate_w)


# ----------------------------------------------------------------------------
# Kernel 2: fused MoE experts + shared expert (stacked as expert index E).
#   grid = (token tiles [parallel], schedule slots [arbitrary], I tiles [arb]).
#   acc (f32) is a resident VMEM scratch; output written once per token tile.
# ----------------------------------------------------------------------------
def _moe_kernel(aids_ref, nact_ref, x_ref, w13_ref, w2_ref, cw_ref, o_ref,
                acc_ref, cws_ref):
    e = pl.program_id(1)
    ki = pl.program_id(2)
    n_act = nact_ref[0]

    @pl.when((e == 0) & (ki == 0))
    def _init():
        acc_ref[...] = jnp.zeros_like(acc_ref)

    @pl.when((e < n_act) & (ki == 0))
    def _select_cw():
        # combine-weight column of the active expert: masked lane reduce
        # (no dynamic lane slice, cw stays one resident (T_t, E+1) block).
        aid = aids_ref[e]
        lane = jax.lax.broadcasted_iota(jnp.int32, cw_ref.shape, 1)
        cws_ref[...] = jnp.sum(jnp.where(lane == aid, cw_ref[...], 0.0),
                               axis=1, keepdims=True)

    @pl.when(e < n_act)
    def _compute():
        x_bf = x_ref[...]                              # already bf16 (hoisted)
        g = jnp.dot(x_bf, w13_ref[0, 0], preferred_element_type=jnp.float32)
        u = jnp.dot(x_bf, w13_ref[0, 1], preferred_element_type=jnp.float32)
        h = (g * jax.nn.sigmoid(g)) * u                # SiluAndMul, f32
        part = jnp.dot(h.astype(jnp.bfloat16), w2_ref[0],
                       preferred_element_type=jnp.float32)
        acc_ref[...] += cws_ref[...] * part

    @pl.when((e == pl.num_programs(1) - 1) & (ki == pl.num_programs(2) - 1))
    def _finalize():
        o_ref[...] = acc_ref[...].astype(o_ref.dtype)


def fused_moe(x_bf, cw, active_ids, n_active, w13, w2, *, t_tile, i_tile,
              out_dtype):
    T, H = x_bf.shape
    E1 = w13.shape[0]                       # num routed experts + 1 (shared)
    I_pad = w2.shape[1]
    assert T % t_tile == 0 and I_pad % i_tile == 0 and H % 128 == 0
    grid = (T // t_tile, E1, I_pad // i_tile)

    # VMEM budget: double-buffered streamed blocks + resident scratch.
    out_isize = jnp.dtype(out_dtype).itemsize
    est = (2 * (t_tile * H * 2                 # x_bf block
                + 2 * H * i_tile * 2           # w13 tile (gate|up)
                + i_tile * H * 2               # w2 tile
                + t_tile * E1 * 4              # combine weights
                + t_tile * H * out_isize)      # out block
           + t_tile * H * 4 + t_tile * 4)      # acc + cw scratch
    vmem_limit = int(min(48 * 2**20, max(32 * 2**20, est * 5 // 4)))

    return pl.pallas_call(
        _moe_kernel,
        out_shape=jax.ShapeDtypeStruct((T, H), out_dtype),
        grid_spec=pltpu.PrefetchScalarGridSpec(
            num_scalar_prefetch=2,
            grid=grid,
            in_specs=[
                pl.BlockSpec((t_tile, H), lambda t, e, k, aids, na: (t, 0)),
                pl.BlockSpec((1, 2, H, i_tile),
                             lambda t, e, k, aids, na: (aids[e], 0, 0, k)),
                pl.BlockSpec((1, i_tile, H),
                             lambda t, e, k, aids, na: (aids[e], k, 0)),
                pl.BlockSpec((t_tile, E1), lambda t, e, k, aids, na: (t, 0)),
            ],
            out_specs=pl.BlockSpec((t_tile, H),
                                   lambda t, e, k, aids, na: (t, 0)),
            scratch_shapes=[pltpu.VMEM((t_tile, H), jnp.float32),
                            pltpu.VMEM((t_tile, 1), jnp.float32)],
        ),
        compiler_params=pltpu.CompilerParams(
            dimension_semantics=("parallel", "arbitrary", "arbitrary"),
            vmem_limit_bytes=vmem_limit),
    )(active_ids, n_active, x_bf, w13, w2, cw)


# ----------------------------------------------------------------------------
# Routing glue (pangu_group8_topk, num_voted_experts == 8, ep_size == 1)
# ----------------------------------------------------------------------------
def pangu_group8_topk(router_logits, router_scale, top_k):
    T, E = router_logits.shape
    assert E % top_k == 0, "num_experts must be divisible by top_k"
    experts_per_group = E // top_k
    scores = jax.nn.softmax(router_logits, axis=1)
    scores_g = scores.reshape(T, top_k, experts_per_group)
    topk_weights = jnp.max(scores_g, axis=-1)                        # [T,top_k]
    topk_ids = (jnp.argmax(scores_g, axis=-1).astype(jnp.int32)
                + jnp.arange(0, E, experts_per_group, dtype=jnp.int32)[None, :])
    router_w = router_scale.reshape(-1)[topk_ids]
    return topk_weights * router_w, topk_ids


def combine_weights_with_shared(topk_weights, topk_ids, num_experts):
    """Dense [T, E+1] combine matrix; last column (shared expert) is 1.0."""
    T = topk_ids.shape[0]
    onehot = (topk_ids[:, :, None]
              == jnp.arange(num_experts, dtype=jnp.int32)[None, None, :])
    cw_routed = jnp.sum(
        jnp.where(onehot, topk_weights[:, :, None].astype(jnp.float32), 0.0),
        axis=1)
    return jnp.concatenate([cw_routed, jnp.ones((T, 1), jnp.float32)], axis=1)


def expert_schedule(topk_ids, num_experts):
    """Schedule of length E+1: shared expert (id=E) first, then active routed
    experts; padded slots repeat the last active id (weight DMA elided)."""
    flat = topk_ids.reshape(-1)
    hit = (flat[:, None]
           == jnp.arange(num_experts, dtype=jnp.int32)[None, :]).any(axis=0)
    n_routed = jnp.sum(hit.astype(jnp.int32))
    order = jnp.argsort(jnp.logical_not(hit), stable=True).astype(jnp.int32)
    last_active = order[jnp.maximum(n_routed - 1, 0)]
    idx = jnp.arange(num_experts, dtype=jnp.int32)
    routed = jnp.where(idx < n_routed, order, last_active)
    shared = jnp.full((1,), num_experts, jnp.int32)
    active_ids = jnp.concatenate([shared, routed])                  # (E+1,)
    n_active = jnp.reshape(n_routed + 1, (1,)).astype(jnp.int32)
    return active_ids, n_active


# ----------------------------------------------------------------------------
# Weight prep (done once, like weight loading): stack the shared expert as
# expert index E; pad all intermediate dims to a common 128-aligned I_pad
# (zero padding is an exact no-op through silu(g)*u @ w_down).
# ----------------------------------------------------------------------------
def prepare_params(raw, *, i_tile_pref=256):
    E, H, I_moe = raw["w_gate"].shape
    I_sh = raw["shared_w_gate"].shape[1]
    I_max = max(I_moe, I_sh)
    i_tile = min(i_tile_pref, _round_up(I_max, 128))
    I_pad = _round_up(I_max, i_tile)

    def pad_i(w, axis):
        if w.shape[axis] == I_pad:
            return w
        cfg = [(0, 0)] * w.ndim
        cfg[axis] = (0, I_pad - w.shape[axis])
        return jnp.pad(w, cfg)

    g = jnp.concatenate([pad_i(raw["w_gate"], 2),
                         pad_i(raw["shared_w_gate"], 1)[None]], axis=0)
    u = jnp.concatenate([pad_i(raw["w_up"], 2),
                         pad_i(raw["shared_w_up"], 1)[None]], axis=0)
    d = jnp.concatenate([pad_i(raw["w_down"], 1),
                         pad_i(raw["shared_w_down"], 0)[None]], axis=0)
    params = {
        "gate_w": raw["gate_w"].astype(jnp.float32),
        "router_scale": raw["router_scale"].astype(jnp.float32),
        "w13": jnp.stack([g, u], axis=1).astype(jnp.bfloat16),  # (E+1,2,H,Ip)
        "w2": d.astype(jnp.bfloat16),                            # (E+1,Ip,H)
    }
    return params, i_tile


# ----------------------------------------------------------------------------
# Full block forward
# ----------------------------------------------------------------------------
def pangu_moe_block(hidden_states, params, *, top_k, i_tile, t_tile_pref=256):
    T, H = hidden_states.shape
    x = hidden_states.reshape(-1, H)
    E = params["w13"].shape[0] - 1

    t_tile = min(t_tile_pref, _round_up(T, 8))
    T_pad = _round_up(T, t_tile)
    if T_pad != T:
        x = jnp.pad(x, ((0, T_pad - T), (0, 0)))

    # router gate + hoisted bf16 cast of x (one kernel)
    router_logits, x_bf = router_gate(x, params["gate_w"], t_tile)

    # custom routing + dense combine matrix + active-expert schedule (tiny XLA)
    topk_w, topk_ids = pangu_group8_topk(router_logits,
                                         params["router_scale"], top_k)
    cw = combine_weights_with_shared(topk_w, topk_ids, E)
    active_ids, n_active = expert_schedule(topk_ids, E)

    # fused routed experts + shared expert + final add (one kernel)
    out = fused_moe(x_bf, cw, active_ids, n_active, params["w13"],
                    params["w2"], t_tile=t_tile, i_tile=i_tile,
                    out_dtype=hidden_states.dtype)
    # TODO(synk): tensor_model_parallel_all_reduce is a no-op with tp_size == 1.
    return out[:T].reshape(T, H)


# ----------------------------------------------------------------------------
# Pure-JAX reference (bf16 weights / bf16 MXU operands, f32 accumulation)
# ----------------------------------------------------------------------------
def reference(hidden_states, raw, top_k):
    x = hidden_states
    bf, f32 = jnp.bfloat16, jnp.float32

    def mm(a, b):
        return jnp.dot(a.astype(bf), b.astype(bf), preferred_element_type=f32)

    silu = lambda v: v * jax.nn.sigmoid(v)

    shared = mm(silu(mm(x, raw["shared_w_gate"])) * mm(x, raw["shared_w_up"]),
                raw["shared_w_down"])

    logits = jnp.dot(x.astype(f32), raw["gate_w"].astype(f32),
                     preferred_element_type=f32)
    topk_w, topk_ids = pangu_group8_topk(logits, raw["router_scale"], top_k)
    E = raw["w_gate"].shape[0]
    onehot = (topk_ids[:, :, None]
              == jnp.arange(E, dtype=jnp.int32)[None, None, :])
    cw = jnp.sum(jnp.where(onehot, topk_w[:, :, None].astype(f32), 0.0), axis=1)

    out = jnp.zeros_like(shared)
    for e in range(E):
        he = silu(mm(x, raw["w_gate"][e])) * mm(x, raw["w_up"][e])
        out = out + cw[:, e:e + 1] * mm(he, raw["w_down"][e])
    return (out + shared).astype(hidden_states.dtype)


# ----------------------------------------------------------------------------
if __name__ == "__main__":
    # small config (128-aligned so gate/up splits & lane tiles are exact views):
    # hidden_size=128, num_experts=8, num_experts_per_tok=4,
    # moe_intermediate_size=128, shared_expert_intermediate_size=128, tokens=8
    T, H = 8, 128
    E, TOPK, I_MOE, I_SH = 8, 4, 128, 128

    key = jax.random.PRNGKey(0)
    ks = jax.random.split(key, 9)
    s = 0.05
    raw = {
        "gate_w":        s * jax.random.normal(ks[0], (H, E), jnp.float32),
        "router_scale":  1.0 + 0.05 * jax.random.normal(ks[1], (1, E), jnp.float32),
        "w_gate":        s * jax.random.normal(ks[2], (E, H, I_MOE), jnp.float32),
        "w_up":          s * jax.random.normal(ks[3], (E, H, I_MOE), jnp.float32),
        "w_down":        s * jax.random.normal(ks[4], (E, I_MOE, H), jnp.float32),
        "shared_w_gate": s * jax.random.normal(ks[5], (H, I_SH), jnp.float32),
        "shared_w_up":   s * jax.random.normal(ks[6], (H, I_SH), jnp.float32),
        "shared_w_down": s * jax.random.normal(ks[7], (I_SH, H), jnp.float32),
    }
    x = jax.random.normal(ks[8], (T, H), jnp.float32)

    params, i_tile = prepare_params(raw)
    fwd = jax.jit(functools.partial(pangu_moe_block, top_k=TOPK, i_tile=i_tile))
    out = fwd(x, params)
    jax.block_until_ready(out)

    ref = reference(x, raw, TOPK)
    assert out.shape == (T, H), out.shape
    err = float(jnp.max(jnp.abs(out.astype(jnp.float32) - ref.astype(jnp.float32))))
    assert err < 2e-2, f"max abs err {err}"
    print("KERNEL_OK")
</pallas_src>

<mosaic_0001>
module attributes {stable_mosaic.version = 11 : i64} {
  func.func @_gate_kernel(%arg0: i32, %arg1: memref<8x128xf32, #tpu.memory_space<vmem>>, %arg2: memref<128x8xf32, #tpu.memory_space<vmem>>, %arg3: memref<8x8xf32, #tpu.memory_space<vmem>>, %arg4: memref<8x128xbf16, #tpu.memory_space<vmem>>) attributes {dimension_semantics = [#tpu.dimension_semantics<parallel>], iteration_bounds = array<i64: 1>, scalar_prefetch = 0 : i64, scratch_operands = 0 : i64, tpu.core_type = #tpu.core_type<tc>, window_params = [{transform_indices = @transform_0, window_bounds = array<i64: 8, 128>}, {pipeline_mode = #tpu.pipeline_mode<synchronous>, transform_indices = @transform_1, window_bounds = array<i64: 128, 8>}, {transform_indices = @transform_2, window_bounds = array<i64: 8, 8>}, {transform_indices = @transform_3, window_bounds = array<i64: 8, 128>}]} {
    %c0 = arith.constant 0 : index
    %c0_0 = arith.constant 0 : index
    %0 = vector.load %arg1[%c0, %c0_0] : memref<8x128xf32, #tpu.memory_space<vmem>>, vector<8x128xf32>
    %c0_1 = arith.constant 0 : index
    %c0_2 = arith.constant 0 : index
    %1 = vector.load %arg2[%c0_1, %c0_2] : memref<128x8xf32, #tpu.memory_space<vmem>>, vector<128x8xf32>
    %cst = arith.constant dense<0.000000e+00> : vector<8x8xf32>
    %2 = tpu.matmul %0, %1, %cst {dimension_numbers = #tpu.dot_dimension_numbers<[1], [0], [0], [1], [0, 0, 1, 1], [], []>} : vector<8x128xf32>, vector<128x8xf32>, vector<8x8xf32> -> vector<8x8xf32>
    %c0_3 = arith.constant 0 : index
    %c0_4 = arith.constant 0 : index
    %3 = vector.load %arg3[%c0_3, %c0_4] : memref<8x8xf32, #tpu.memory_space<vmem>>, vector<8x8xf32>
    tpu.vector_store %arg3[%c0_3, %c0_4], %2 {strides = array<i32>} : memref<8x8xf32, #tpu.memory_space<vmem>>, vector<8x8xf32>,
    %4 = arith.truncf %0 : vector<8x128xf32> to vector<8x128xbf16>
    %c0_5 = arith.constant 0 : index
    %c0_6 = arith.constant 0 : index
    %5 = vector.load %arg4[%c0_5, %c0_6] : memref<8x128xbf16, #tpu.memory_space<vmem>>, vector<8x128xbf16>
    tpu.vector_store %arg4[%c0_5, %c0_6], %4 {strides = array<i32>} : memref<8x128xbf16, #tpu.memory_space<vmem>>, vector<8x128xbf16>,
    return
  }
  func.func @transform_0(%arg0: i32) -> (i32, i32) {
    %c0_i32 = arith.constant 0 : i32
    %c0_i32_0 = arith.constant 0 : i32
    return %arg0, %c0_i32 : i32, i32
  }
  func.func @transform_1(%arg0: i32) -> (i32, i32) {
    %c0_i32 = arith.constant 0 : i32
    %c0_i32_0 = arith.constant 0 : i32
    %c0_i32_1 = arith.constant 0 : i32
    return %c0_i32, %c0_i32_0 : i32, i32
  }
  func.func @transform_2(%arg0: i32) -> (i32, i32) {
    %c0_i32 = arith.constant 0 : i32
    %c0_i32_0 = arith.constant 0 : i32
    return %arg0, %c0_i32 : i32, i32
  }
  func.func @transform_3(%arg0: i32) -> (i32, i32) {
    %c0_i32 = arith.constant 0 : i32
    %c0_i32_0 = arith.constant 0 : i32
    return %arg0, %c0_i32 : i32, i32
  }
}

module attributes {stable_mosaic.version = 11 : i64} {
  func.func @_moe_kernel(%arg0: i32, %arg1: i32, %arg2: i32, %arg3: memref<9xi32, #tpu.memory_space<smem>>, %arg4: memref<1xi32, #tpu.memory_space<smem>>, %arg5: memref<8x128xbf16, #tpu.memory_space<vmem>>, %arg6: memref<1x2x128x128xbf16, #tpu.memory_space<vmem>>, %arg7: memref<1x128x128xbf16, #tpu.memory_space<vmem>>, %arg8: memref<8x9xf32, #tpu.memory_space<vmem>>, %arg9: memref<8x128xf32, #tpu.memory_space<vmem>>, %arg10: memref<8x128xf32, #tpu.memory_space<vmem>>, %arg11: memref<8x1xf32, #tpu.memory_space<vmem>>) attributes {dimension_semantics = [#tpu.dimension_semantics<parallel>, #tpu.dimension_semantics<arbitrary>, #tpu.dimension_semantics<arbitrary>], iteration_bounds = array<i64: 1, 9, 1>, scalar_prefetch = 2 : i64, scratch_operands = 2 : i64, tpu.core_type = #tpu.core_type<tc>, window_params = [{transform_indices = @transform_0, window_bounds = array<i64: 8, 128>}, {transform_indices = @transform_1, window_bounds = array<i64: 1, 2, 128, 128>}, {transform_indices = @transform_2, window_bounds = array<i64: 1, 128, 128>}, {transform_indices = @transform_3, window_bounds = array<i64: 8, 9>}, {transform_indices = @transform_4, window_bounds = array<i64: 8, 128>}]} {
    %c0 = arith.constant 0 : index
    %0 = memref.load %arg4[%c0] : memref<1xi32, #tpu.memory_space<smem>>
    %c0_i32 = arith.constant 0 : i32
    %1 = arith.cmpi eq, %arg1, %c0_i32 : i32
    %c0_i32_0 = arith.constant 0 : i32
    %2 = arith.cmpi eq, %arg2, %c0_i32_0 : i32
    %3 = arith.andi %1, %2 : i1
    %4 = arith.extui %3 : i1 to i32
    %c0_i32_1 = arith.constant 0 : i32
    %5 = arith.cmpi ne, %4, %c0_i32_1 : i32
    scf.if %5 {
      %cst = arith.constant 0.000000e+00 : f32
      %19 = vector.broadcast %cst : f32 to vector<8x128xf32>
      %c0_7 = arith.constant 0 : index
      %c0_8 = arith.constant 0 : index
      %20 = vector.load %arg10[%c0_7, %c0_8] : memref<8x128xf32, #tpu.memory_space<vmem>>, vector<8x128xf32>
      tpu.vector_store %arg10[%c0_7, %c0_8], %19 {strides = array<i32>} : memref<8x128xf32, #tpu.memory_space<vmem>>, vector<8x128xf32>,
    } else {
    }
    %6 = arith.cmpi slt, %arg1, %0 : i32
    %c0_i32_2 = arith.constant 0 : i32
    %7 = arith.cmpi eq, %arg2, %c0_i32_2 : i32
    %8 = arith.andi %6, %7 : i1
    %9 = arith.extui %8 : i1 to i32
    %c0_i32_3 = arith.constant 0 : i32
    %10 = arith.cmpi ne, %9, %c0_i32_3 : i32
    scf.if %10 {
      %19 = arith.index_cast %arg1 : i32 to index
      %20 = memref.load %arg3[%19] : memref<9xi32, #tpu.memory_space<smem>>
      %21 = tpu.iota {dimensions = array<i32: 1>} : vector<8x9xi32>
      %22 = vector.broadcast %20 : i32 to vector<8x9xi32>
      %23 = arith.cmpi eq, %21, %22 : vector<8x9xi32>
      %c0_7 = arith.constant 0 : index
      %c0_8 = arith.constant 0 : index
      %24 = vector.load %arg8[%c0_7, %c0_8] : memref<8x9xf32, #tpu.memory_space<vmem>>, vector<8x9xf32>
      %cst = arith.constant 0.000000e+00 : f32
      %25 = vector.broadcast %cst : f32 to vector<8x9xf32>
      %26 = arith.select %23, %24, %25 : vector<8x9xi1>, vector<8x9xf32>
      %cst_9 = arith.constant dense<0.000000e+00> : vector<8xf32>
      %27 = vector.multi_reduction <add>, %26, %cst_9 [1] : vector<8x9xf32> to vector<8xf32>
      %28 = vector.shape_cast %27 : vector<8xf32> to vector<8x1xf32>
      %c0_10 = arith.constant 0 : index
      %c0_11 = arith.constant 0 : index
      %29 = vector.load %arg11[%c0_10, %c0_11] : memref<8x1xf32, #tpu.memory_space<vmem>>, vector<8x1xf32>
      tpu.vector_store %arg11[%c0_10, %c0_11], %28 {strides = array<i32>} : memref<8x1xf32, #tpu.memory_space<vmem>>, vector<8x1xf32>,
    } else {
    }
    %11 = arith.cmpi slt, %arg1, %0 : i32
    %12 = arith.extui %11 : i1 to i32
    %c0_i32_4 = arith.constant 0 : i32
    %13 = arith.cmpi ne, %12, %c0_i32_4 : i32
    scf.if %13 {
      %c0_7 = arith.constant 0 : index
      %c0_8 = arith.constant 0 : index
      %19 = vector.load %arg5[%c0_7, %c0_8] : memref<8x128xbf16, #tpu.memory_space<vmem>>, vector<8x128xbf16>
      %c0_9 = arith.constant 0 : index
      %c0_10 = arith.constant 0 : index
      %c0_11 = arith.constant 0 : index
      %c0_12 = arith.constant 0 : index
      %20 = vector.load %arg6[%c0_9, %c0_10, %c0_11, %c0_12] : memref<1x2x128x128xbf16, #tpu.memory_space<vmem>>, vector<1x1x128x128xbf16>
      %21 = vector.shape_cast %20 : vector<1x1x128x128xbf16> to vector<128x128xbf16>
      %cst = arith.constant dense<0.000000e+00> : vector<8x128xf32>
      %22 = tpu.matmul %19, %21, %cst {dimension_numbers = #tpu.dot_dimension_numbers<[1], [0], [0], [1], [0, 0, 1, 1], [], []>} : vector<8x128xbf16>, vector<128x128xbf16>, vector<8x128xf32> -> vector<8x128xf32>
      %c0_13 = arith.constant 0 : index
      %c1 = arith.constant 1 : index
      %c0_14 = arith.constant 0 : index
      %c0_15 = arith.constant 0 : index
      %23 = vector.load %arg6[%c0_13, %c1, %c0_14, %c0_15] : memref<1x2x128x128xbf16, #tpu.memory_space<vmem>>, vector<1x1x128x128xbf16>
      %24 = vector.shape_cast %23 : vector<1x1x128x128xbf16> to vector<128x128xbf16>
      %cst_16 = arith.constant dense<0.000000e+00> : vector<8x128xf32>
      %25 = tpu.matmul %19, %24, %cst_16 {dimension_numbers = #tpu.dot_dimension_numbers<[1], [0], [0], [1], [0, 0, 1, 1], [], []>} : vector<8x128xbf16>, vector<128x128xbf16>, vector<8x128xf32> -> vector<8x128xf32>
      %26 = arith.negf %22 : vector<8x128xf32>
      %27 = math.exp %26 : vector<8x128xf32>
      %cst_17 = arith.constant 1.000000e+00 : f32
      %28 = vector.broadcast %cst_17 : f32 to vector<8x128xf32>
      %29 = arith.addf %28, %27 : vector<8x128xf32>
      %30 = arith.divf %28, %29 : vector<8x128xf32>
      %31 = arith.mulf %22, %30 : vector<8x128xf32>
      %32 = arith.mulf %31, %25 : vector<8x128xf32>
      %33 = arith.truncf %32 : vector<8x128xf32> to vector<8x128xbf16>
      %c0_18 = arith.constant 0 : index
      %c0_19 = arith.constant 0 : index
      %c0_20 = arith.constant 0 : index
      %34 = vector.load %arg7[%c0_18, %c0_19, %c0_20] : memref<1x128x128xbf16, #tpu.memory_space<vmem>>, vector<1x128x128xbf16>
      %35 = vector.shape_cast %34 : vector<1x128x128xbf16> to vector<128x128xbf16>
      %cst_21 = arith.constant dense<0.000000e+00> : vector<8x128xf32>
      %36 = tpu.matmul %33, %35, %cst_21 {dimension_numbers = #tpu.dot_dimension_numbers<[1], [0], [0], [1], [0, 0, 1, 1], [], []>} : vector<8x128xbf16>, vector<128x128xbf16>, vector<8x128xf32> -> vector<8x128xf32>
      %c0_22 = arith.constant 0 : index
      %c0_23 = arith.constant 0 : index
      %37 = vector.load %arg10[%c0_22, %c0_23] : memref<8x128xf32, #tpu.memory_space<vmem>>, vector<8x128xf32>
      %c0_24 = arith.constant 0 : index
      %c0_25 = arith.constant 0 : index
      %38 = vector.load %arg11[%c0_24, %c0_25] : memref<8x1xf32, #tpu.memory_space<vmem>>, vector<8x1xf32>
      %39 = vector.broadcast %38 : vector<8x1xf32> to vector<8x128xf32>
      %40 = arith.mulf %39, %36 : vector<8x128xf32>
      %41 = arith.addf %37, %40 : vector<8x128xf32>
      %c0_26 = arith.constant 0 : index
      %c0_27 = arith.constant 0 : index
      %42 = vector.load %arg10[%c0_26, %c0_27] : memref<8x128xf32, #tpu.memory_space<vmem>>, vector<8x128xf32>
      tpu.vector_store %arg10[%c0_26, %c0_27], %41 {strides = array<i32>} : memref<8x128xf32, #tpu.memory_space<vmem>>, vector<8x128xf32>,
    } else {
    }
    %c8_i32 = arith.constant 8 : i32
    %14 = arith.cmpi eq, %arg1, %c8_i32 : i32
    %c0_i32_5 = arith.constant 0 : i32
    %15 = arith.cmpi eq, %arg2, %c0_i32_5 : i32
    %16 = arith.andi %14, %15 : i1
    %17 = arith.extui %16 : i1 to i32
    %c0_i32_6 = arith.constant 0 : i32
    %18 = arith.cmpi ne, %17, %c0_i32_6 : i32
    scf.if %18 {
      %c0_7 = arith.constant 0 : index
      %c0_8 = arith.constant 0 : index
      %19 = vector.load %arg10[%c0_7, %c0_8] : memref<8x128xf32, #tpu.memory_space<vmem>>, vector<8x128xf32>
      %c0_9 = arith.constant 0 : index
      %c0_10 = arith.constant 0 : index
      %20 = vector.load %arg9[%c0_9, %c0_10] : memref<8x128xf32, #tpu.memory_space<vmem>>, vector<8x128xf32>
      tpu.vector_store %arg9[%c0_9, %c0_10], %19 {strides = array<i32>} : memref<8x128xf32, #tpu.memory_space<vmem>>, vector<8x128xf32>,
    } else {
    }
    return
  }
  func.func @transform_0(%arg0: i32, %arg1: i32, %arg2: i32, %arg3: memref<9xi32, #tpu.memory_space<smem>>, %arg4: memref<1xi32, #tpu.memory_space<smem>>) -> (i32, i32) {
    %c0_i32 = arith.constant 0 : i32
    %c0_i32_0 = arith.constant 0 : i32
    return %arg0, %c0_i32 : i32, i32
  }
  func.func @transform_1(%arg0: i32, %arg1: i32, %arg2: i32, %arg3: memref<9xi32, #tpu.memory_space<smem>>, %arg4: memref<1xi32, #tpu.memory_space<smem>>) -> (i32, i32, i32, i32) {
    %0 = arith.index_cast %arg1 : i32 to index
    %1 = memref.load %arg3[%0] : memref<9xi32, #tpu.memory_space<smem>>
    %c0_i32 = arith.constant 0 : i32
    %c0_i32_0 = arith.constant 0 : i32
    %c0_i32_1 = arith.constant 0 : i32
    return %1, %c0_i32, %c0_i32_0, %arg2 : i32, i32, i32, i32
  }
  func.func @transform_2(%arg0: i32, %arg1: i32, %arg2: i32, %arg3: memref<9xi32, #tpu.memory_space<smem>>, %arg4: memref<1xi32, #tpu.memory_space<smem>>) -> (i32, i32, i32) {
    %0 = arith.index_cast %arg1 : i32 to index
    %1 = memref.load %arg3[%0] : memref<9xi32, #tpu.memory_space<smem>>
    %c0_i32 = arith.constant 0 : i32
    %c0_i32_0 = arith.constant 0 : i32
    return %1, %arg2, %c0_i32 : i32, i32, i32
  }
  func.func @transform_3(%arg0: i32, %arg1: i32, %arg2: i32, %arg3: memref<9xi32, #tpu.memory_space<smem>>, %arg4: memref<1xi32, #tpu.memory_space<smem>>) -> (i32, i32) {
    %c0_i32 = arith.constant 0 : i32
    %c0_i32_0 = arith.constant 0 : i32
    return %arg0, %c0_i32 : i32, i32
  }
  func.func @transform_4(%arg0: i32, %arg1: i32, %arg2: i32, %arg3: memref<9xi32, #tpu.memory_space<smem>>, %arg4: memref<1xi32, #tpu.memory_space<smem>>) -> (i32, i32) {
    %c0_i32 = arith.constant 0 : i32
    %c0_i32_0 = arith.constant 0 : i32
    return %arg0, %c0_i32 : i32, i32
  }
}

</mosaic_0001>

<bundles_post_ra>
// kernel: eq.24
= control target key start
LH: loop header
LB: loop body
LE: loop exit
PB: predicated region body
PF: predicated region fallthrough
CT: control target
= control target key end

     0   :  { %s67_s10 = smov 28   ;;  %s68_s11 = smov 20   ;;  %vm3_vm0 = vcmask 31744   ;;  %vm9_vm1 = vcmask 261344   ;;  %vm15_vm2 = vcmask 228544   ;;  %vm21_vm3 = vcmask 195744   ;;  %s111_s0 = inlined_call_operand.vmem [shape: s32[8,4], index: 0, kind: input, shape index: {}]   ;;  %s112_s1 = inlined_call_operand.vmem [shape: s32[32], index: 1, kind: output, shape index: {}]  }
   0x1   :  { %v53_v0 = vld [vmem:[%s111_s0 + $0x7] sm:$0x1]   ;;  %v55_v1 = vld [vmem:[%s111_s0 + $0x5] sm:$0x1]   ;;  %v54_v2 = vld [vmem:[%s111_s0 + $0x6] sm:$0x1]  }
   0x2   :  { %7 = vrot.lane.b32.xlu0 %v53_v0, %s67_s10  ;;  %19 = vrot.lane.b32.xlu1 %v55_v1, %s68_s11  ;;  %v56_v3 = vld [vmem:[%s111_s0 + $0x4] sm:$0x1]   ;;  %v2_v4 = vld [vmem:[%s111_s0] sm:$0x1]   ;;  %s69_s18 = smov 24   ;;  %s70_s19 = smov 16  }
   0x3   :  { %4 = vst.msk [vmem:[#allocation0] sm:$0x1] %vm3_vm0, %v2_v4   ;;  %v57_v5 = vld [vmem:[%s111_s0 + $0x3] sm:$0x1]   ;;  %v58_v6 = vld [vmem:[%s111_s0 + $0x2] sm:$0x1]  }
   0x4   :  { %s71_s24 = smov 12   ;;  %s72_s25 = smov 8   ;;  %v59_v7 = vld [vmem:[%s111_s0 + $0x1] sm:$0x1]   ;;  %vm27_vm4 = vcmask 162944   ;;  %vm33_vm5 = vcmask 130144  }
   0x5   :  { %s73_s0 = smov 4   ;;  %vm39_vm6 = vcmask 97344   ;;  %vm45_vm7 = vcmask 64544  }
   0x6   :  { %13 = vrot.lane.b32.xlu0 %v54_v2, %s69_s18  ;;  %25 = vrot.lane.b32.xlu1 %v56_v3, %s70_s19 }
   0xa   :  { %31 = vrot.lane.b32.xlu0 %v57_v5, %s71_s24  ;;  %37 = vrot.lane.b32.xlu1 %v58_v6, %s72_s25 }
   0xe   :  { %43 = vrot.lane.b32.xlu0 %v59_v7, %s73_s0 }
  0x74   :  { %v8_v8 = vpop.permute.xlu0 %7   ;;  %v20_v9 = vpop.permute.xlu1 %19  }
  0x75   :  { %10 = vst.msk [vmem:[#allocation0] sm:$0x1] %vm9_vm1, %v8_v8  }
  0x78   :  { %v14_v10 = vpop.permute.xlu0 %13   ;;  %v26_v11 = vpop.permute.xlu1 %25  }
  0x79   :  { %16 = vst.msk [vmem:[#allocation0] sm:$0x1] %vm15_vm2, %v14_v10  }
  0x7a   :  { %22 = vst.msk [vmem:[#allocation0] sm:$0x1] %vm21_vm3, %v20_v9  }
  0x7b   :  { %28 = vst.msk [vmem:[#allocation0] sm:$0x1] %vm27_vm4, %v26_v11  }
  0x7c   :  { %v32_v12 = vpop.permute.xlu0 %31   ;;  %v38_v13 = vpop.permute.xlu1 %37  }
  0x7d   :  { %34 = vst.msk [vmem:[#allocation0] sm:$0x1] %vm33_vm5, %v32_v12  }
  0x7e   :  { %40 = vst.msk [vmem:[#allocation0] sm:$0x1] %vm39_vm6, %v38_v13  }
  0x80   :  { %v44_v14 = vpop.permute.xlu0 %43  }
  0x81   :  { %46 = vst.msk [vmem:[#allocation0] sm:$0x1] %vm45_vm7, %v44_v14  }
  0x88   :  { %v50_v15 = vld [vmem:[#allocation0] sm:$0x1] }
  0x89   :  { %52 = vst [vmem:[%s112_s1] sm:$0x1] %v50_v15 }

// kernel: mul.3
= control target key start
LH: loop header
LB: loop body
LE: loop exit
PB: predicated region body
PF: predicated region fallthrough
CT: control target
= control target key end

     0   :  { %s34_s0 = inlined_call_operand.vmem [shape: f32[8,4], index: 0, kind: input, shape index: {}]   ;;  %s35_s1 = inlined_call_operand.vmem [shape: f32[8,4], index: 1, kind: input, shape index: {}]   ;;  %s36_s2 = inlined_call_operand.vmem [shape: f32[8,4], index: 2, kind: output, shape index: {}]  }
   0x1   :  { %v3_v0 = vld [vmem:[%s34_s0] sm:$0xf] }
   0x2   :  { %v4_v1 = vld [vmem:[%s35_s1] sm:$0xf] }
   0x3   :  { %v7_v2 = vmul.f32 %v4_v1, %v3_v0 }
   0x5   :  { %9 = vst [vmem:[%s36_s2] sm:$0xf] %v7_v2 }

// kernel: pangu_moe_block.2
= control target key start
LH: loop header
LB: loop body
LE: loop exit
PB: predicated region body
PF: predicated region fallthrough
CT: control target
= control target key end

     0   :  { %v191_v0 = vmov 0.0|0.0   ;;  %vm192_vm0 = vmmov 0   ;;  %v193_v4 = vmov 0.0   ;;  %vm100_vm1 = vcmask 64512   ;;  %s271_s1 = inlined_call_operand.vmem [shape: f32[128,8], index: 1, kind: input, shape index: {}]   ;;  %s272_s0 = inlined_call_operand.vmem [shape: f32[8,128], index: 0, kind: input, shape index: {}]   ;;  %s273_s3 = inlined_call_operand.vmem [shape: bf16[8,128], index: 3, kind: output, shape index: {1}]   ;;  %s274_s2 = inlined_call_operand.vmem [shape: f32[8,8], index: 2, kind: output, shape index: {0}]  }
   0x1   :  { %164 = vmatprep.subr.bf16.mxu0 %v191_v0  ;;  %v14_v1 = vld [vmem:[%s271_s1] sm:$0xff]  ;;  %v15_v2 = vld [vmem:[%s271_s1 + $0x8] sm:$0xff]  ;;  %v16_v3 = vld [vmem:[%s271_s1 + $0x10] sm:$0xff]  ;;  %161 = vmatprep.mubr.msk.f32.mxu0 %vm192_vm0, %v193_v4 }
   0x2   :  { %v165_v5 = vpack.c.bf16 %v15_v2, %v14_v1  ;;  %v17_v6 = vld [vmem:[%s271_s1 + $0x18] sm:$0xff]  ;;  %v18_v8 = vld [vmem:[%s271_s1 + $0x20] sm:$0xff]  ;;  %v19_v9 = vld [vmem:[%s271_s1 + $0x28] sm:$0xff] }
   0x3   :  { %v168_v7 = vpack.c.bf16 %v17_v6, %v16_v3  ;;  %v13_v10 = vld [vmem:[%s272_s0] sm:$0xff]  ;;  %v171_v12 = vpack.c.bf16 %v19_v9, %v18_v8  ;;  %v20_v13 = vld [vmem:[%s271_s1 + $0x30] sm:$0xff]  ;;  %v21_v14 = vld [vmem:[%s271_s1 + $0x38] sm:$0xff] }
   0x4   :  { %166 = vmatpush3.bf16.msra.mxu0 %v165_v5  ;;  %v102_v11 = vpack.c.bf16 %v13_v10, %v13_v10  ;;  %v174_v15 = vpack.c.bf16 %v21_v14, %v20_v13  ;;  %v22_v16 = vld [vmem:[%s271_s1 + $0x40] sm:$0xff]  ;;  %v23_v17 = vld [vmem:[%s271_s1 + $0x48] sm:$0xff]  ;;  %v24_v19 = vld [vmem:[%s271_s1 + $0x50] sm:$0xff] }
   0x5   :  { %167 = vmatprep.subr.bf16.mxu0 %v191_v0  ;;  %v177_v18 = vpack.c.bf16 %v23_v17, %v22_v16  ;;  %v25_v20 = vld [vmem:[%s271_s1 + $0x58] sm:$0xff]  ;;  %v26_v22 = vld [vmem:[%s271_s1 + $0x60] sm:$0xff]  ;;  %v27_v23 = vld [vmem:[%s271_s1 + $0x68] sm:$0xff] }
   0x6   :  { %103 = vst [vmem:[%s273_s3] sm:$0xf] %v102_v11  ;;  %v180_v21 = vpack.c.bf16 %v25_v20, %v24_v19  ;;  %v183_v24 = vpack.c.bf16 %v27_v23, %v26_v22  ;;  %v28_v25 = vld [vmem:[%s271_s1 + $0x70] sm:$0xff]  ;;  %v29_v26 = vld [vmem:[%s271_s1 + $0x78] sm:$0xff] }
   0x7   :  { %v186_v27 = vpack.c.bf16 %v29_v26, %v28_v25 }
   0x8   :  { %169 = vmatpush3.bf16.msra.mxu0 %v168_v7 }
   0x9   :  { %170 = vmatprep.subr.bf16.mxu0 %v191_v0 }
   0xc   :  { %172 = vmatpush3.bf16.msra.mxu0 %v171_v12 }
   0xd   :  { %173 = vmatprep.subr.bf16.mxu0 %v191_v0 }
  0x10   :  { %175 = vmatpush3.bf16.msra.mxu0 %v174_v15 }
  0x11   :  { %176 = vmatprep.subr.bf16.mxu0 %v191_v0 }
  0x14   :  { %178 = vmatpush3.bf16.msra.mxu0 %v177_v18 }
  0x15   :  { %179 = vmatprep.subr.bf16.mxu0 %v191_v0 }
  0x18   :  { %181 = vmatpush3.bf16.msra.mxu0 %v180_v21 }
  0x19   :  { %182 = vmatprep.subr.bf16.mxu0 %v191_v0 }
  0x1c   :  { %184 = vmatpush3.bf16.msra.mxu0 %v183_v24 }
  0x1d   :  { %185 = vmatprep.subr.bf16.mxu0 %v191_v0 }
  0x20   :  { %187 = vmatpush3.bf16.msra.mxu0 %v186_v27 }
  0x23   :  { %162 = vmatmul.mubr.f32.vlgmr.msra.gmra.mrb[0].mxu0 %v13_v10 }
  0xf6   :  { %v96_v28 = vpop.f32.mrb[0].mxu0 }
  0xf7   :  { %101 = vst.msk [vmem:[%s274_s2] sm:$0xff] %vm100_vm1, %v96_v28  ;;  %v163_v29 = vpop.f32.mrb[1].mxu0 }

// kernel: pangu_moe_block.3
= control target key start
LH: loop header
LB: loop body
LE: loop exit
PB: predicated region body
PF: predicated region fallthrough
CT: control target
= control target key end

     0   :  { %s1268_s0 = inlined_call_operand.vmem [shape: s32[9], index: 0, kind: input, shape index: {}]   ;;  %s1269_s1 = inlined_call_operand.<no memory space> [shape: s32[1], index: 1, kind: input, shape index: {}]   ;;  %s1270_s2 = inlined_call_operand.vmem [shape: bf16[8,128], index: 2, kind: input, shape index: {}]   ;;  %s1271_s3 = inlined_call_operand.vmem [shape: bf16[9,2,128,128], index: 3, kind: input, shape index: {}]   ;;  %s1272_s4 = inlined_call_operand.vmem [shape: bf16[9,128,128], index: 4, kind: input, shape index: {}]   ;;  %s1273_s5 = inlined_call_operand.vmem [shape: f32[8,9], index: 5, kind: input, shape index: {}]   ;;  %s1274_s6 = inlined_call_operand.hbm [shape: f32[8,128], index: 6, kind: output, shape index: {}]  }
   0x1   :  { %s11_s23 = sshll.u32 %s1268_s0, 4  ;;  %15 = sst [smem:[#allocation6]] %s1269_s1  ;;  %s12_s23 = int_to_ptr.vmem [resolvable:$true] %s11_s23 }
   0x2   :  { %s1014_s26 = scalar_lea.vmem %s12_s23, 16  ;;  %p1019_p1 = scmp.lt.s32.totalorder %s12_s23, %s12_s23 }
   0x3   :  { %p1015_p0 = scmp.ne.s32.totalorder %s12_s23, %s1014_s26  ;;  %p1020_p2 = scmp.lt.s32.totalorder %s1014_s26, %s1014_s26 }
   0x5   :  { %p1021_p3 = por %p1020_p2, %p1019_p1 }
   0x7   :  { %p1022_p4 = pnand %p1021_p3, %p1015_p0 }
   0x9   :  { %1025 = shalt.err (!%p1022_p4)  }
   0xa   :  { %s1082_s27 = smov [#allocation5]  }
   0xb   :  { %14 = dma.vmem_to_smem %s12_s23, 16, %s1082_s27, [#allocation4] }
   0xc   :  { %1064 = dma.done.wait [#allocation4], 16 }
   0xd   :  { %1065 = vsyncadd [#allocation4], 4294967280 }
   0xe   :  { %17 = sfence }
   0xf   :  { %18 = vsyncpa [#allocation8], 0  ;;  %s1129_s28 = smov 0   ;;  %s1131_s0 = smov 0  }
  0x10   :  { %s1133_s29 = smov 0  }
  0x11 LB: > { %s798_s1 = sadd.s32 4294967295, %s1080_s29   ;;  %s39_s30 = sadd.s32 1, %s1076_s0  ;;  %s1080_s29 = sphi %s1133_s29, %s24_s29   ;;  %s1076_s0 = sphi %s1131_s0, %s1277_s0   ;;  %s1072_s28 = sphi %s1129_s28, %s1276_s28  }
  0x12   : > { %p41_p5 = scmp.ge.s32.totalorder %s39_s30, 9  ;;  %p803_p6 = scmp.ge.s32.totalorder %s1080_s29, 1 }
  0x13   : > { %p239_p7 = scmp.lt.s32.totalorder %s1080_s29, 10 }
  0x14   : > { %s1279_s30 = smov (%p41_p5, %s39_s30), 0 }
  0x15   : > { %p240_p8 = pnand %p803_p6, %p239_p7 }
  0x16   : > { %s286_s7 = sld [smem:[#allocation5 + %s1072_s28]] (!%p240_p8)  ;;  %p314_p9 = scmp.eq.s32.totalorder (!%p240_p8), %s1072_s28, 0 }
  0x17   : > { %243 = sbr.rel (%p240_p8) target bundleno = 720 (0x2d0), region = 36  ;;  %s296_s8 = sld [smem:[#allocation5 + %s1072_s28]] (!%p240_p8) }
  0x18   : > { %s1152_s9 = sld [smem:[#allocation6]] (!%p240_p8) }
  0x1c   : > { %p287_p10 = scmp.lt.s32.totalorder (!%p240_p8), %s286_s7, 8 }
  0x1d   : > { %p298_p11 = scmp.lt.s32.totalorder (!%p240_p8), %s296_s8, 8 }
  0x1e   : > { %s1281_s7 = smov (!%p287_p10, %s286_s7), 8  ;;  %319 = sbr.rel (!%p314_p9) target bundleno = 37 (0x25), region = 40 }
  0x1f   : > { %s1283_s8 = smov (!%p298_p11, %s296_s8), 8  ;;  %s857_s10 = sshll.u32 %s1281_s7, 7  ;;  %v1083_v0 = vmov (%p314_p9), 0.0  }
  0x20   : > { %s1158_s13 = scalar_lea.vmem %s1271_s3, %s857_s10  ;;  %s858_s14 = sshll.u32 %s1283_s8, 6  ;;  %320 = vst [vmem:[#allocation2] sm:$0xff] (%p314_p9), %v1083_v0 }
  0x21   : > { %s1163_s17 = scalar_lea.vmem %s1272_s4, %s858_s14 }
  0x25 PF: > { %p321_p12 = scmp.lt.s32.totalorder %s1072_s28, %s1152_s9 }
  0x26   : > { %s326_s18 = sld [smem:[#allocation5 + %s1072_s28]] (%p321_p12)  ;;  %v327_v1 = vlaneseq (%p321_p12)  ;;  %v331_v3 = vld [vmem:[%s1273_s5] sm:$0xff] (%p321_p12)  ;;  %vm333_vm0 = vcmask (%p321_p12), 72704   ;;  %vm337_vm2 = vcmask (%p321_p12), 7168  }
  0x27   : > { %325 = sbr.rel (!%p321_p12) target bundleno = 191 (0xbf), region = 44 }
  0x28   : > { %v328_v2 = vand.u32 (%p321_p12), 127, %v327_v1 }
  0x2c   : > { %v329_v4 = vstv (%p321_p12), %s326_s18 }
  0x2d   : > { %vm330_vm1 = vcmp.eq.s32.totalorder (%p321_p12), %v328_v2, %v329_v4 }
  0x2e   : > { %v332_v5 = vsel %vm330_vm1, %v331_v3, 0.0 }
  0x2f   : > { %v334_v6 = vsel %vm333_vm0, %v332_v5, 0.0 }
  0x30   : > { %335 = vadd.xlane.f32.xlu0 %v334_v6 }
  0xbd   : > { %v336_v7 = vpop.xlane.xlu0 %335 }
  0xbe   : > { %338 = vst.msk [vmem:[#allocation3] sm:$0xff] %vm337_vm2, %v336_v7 }
  0xbf PF: > { %p810_p13 = scmp.ge.s32.totalorder %s1072_s28, %s1152_s9 }
  0xc0   : > { %v986_v8 = vld [vmem:[%s1158_s13] sm:$0xff] (!%p810_p13)   ;;  %v1084_v9 = vmov (!%p810_p13), 0.0   ;;  %v987_v10 = vld [vmem:[%s1158_s13 + $0x8] sm:$0xff] (!%p810_p13)   ;;  %vm1085_vm3 = vmmov (!%p810_p13), 0   ;;  %v988_v11 = vld [vmem:[%s1158_s13 + $0x10] sm:$0xff] (!%p810_p13)   ;;  %v1086_v35 = vmov (!%p810_p13), 0  }
  0xc1   : > { %341 = sbr.rel (%p810_p13) target bundleno = 686 (0x2ae), region = 48  ;;  %889 = vmatprep.subr.bf16.mxu0 (!%p810_p13), %v1084_v9  ;;  %909 = vmatprep.subr.bf16.mxu1 (!%p810_p13), %v1084_v9  ;;  %v993_v12 = vld [vmem:[%s1158_s13 + $0x40] sm:$0xff] (!%p810_p13)   ;;  %v995_v13 = vld [vmem:[%s1158_s13 + $0x48] sm:$0xff] (!%p810_p13)   ;;  %v989_v14 = vld [vmem:[%s1158_s13 + $0x18] sm:$0xff] (!%p810_p13)  }
  0xc2   : > { %890 = vmatpush3.bf16.msra.mxu0 (!%p810_p13), %v986_v8  ;;  %905 = vmatprep.mubr.msk.bf16.mxu0 (!%p810_p13), %vm1085_vm3, %v1084_v9  ;;  %v996_v15 = vld [vmem:[%s1158_s13 + $0x50] sm:$0xff] (!%p810_p13)   ;;  %v990_v16 = vld [vmem:[%s1158_s13 + $0x20] sm:$0xff] (!%p810_p13)   ;;  %v991_v17 = vld [vmem:[%s1158_s13 + $0x28] sm:$0xff] (!%p810_p13)  }
  0xc3   : > { %891 = vmatprep.subr.bf16.mxu0 (!%p810_p13), %v1084_v9  ;;  %925 = vmatprep.mubr.msk.bf16.mxu1 (!%p810_p13), %vm1085_vm3, %v1084_v9  ;;  %v997_v18 = vld [vmem:[%s1158_s13 + $0x58] sm:$0xff] (!%p810_p13)   ;;  %v998_v19 = vld [vmem:[%s1158_s13 + $0x60] sm:$0xff] (!%p810_p13)   ;;  %v992_v20 = vld [vmem:[%s1158_s13 + $0x30] sm:$0xff] (!%p810_p13)  }
  0xc4   : > { %910 = vmatpush3.bf16.msra.mxu1 (!%p810_p13), %v993_v12  ;;  %v999_v21 = vld [vmem:[%s1158_s13 + $0x68] sm:$0xff] (!%p810_p13)   ;;  %v994_v22 = vld [vmem:[%s1158_s13 + $0x38] sm:$0xff] (!%p810_p13)   ;;  %v1000_v23 = vld [vmem:[%s1158_s13 + $0x70] sm:$0xff] (!%p810_p13)   ;;  %985 = vset.pattern.permute.xlu0 (!%p810_p13), %v1086_v35 }
  0xc5   : > { %911 = vmatprep.subr.bf16.mxu1 (!%p810_p13), %v1084_v9  ;;  %v342_v24 = vld [vmem:[%s1270_s2] sm:$0xf] (!%p810_p13)  ;;  %v1001_v25 = vld [vmem:[%s1158_s13 + $0x78] sm:$0xff] (!%p810_p13)   ;;  %v1003_v27 = vld [vmem:[%s1163_s17 + $0x8] sm:$0xff] (!%p810_p13)  }
  0xc6   : > { %892 = vmatpush3.bf16.msra.mxu0 (!%p810_p13), %v987_v10  ;;  %v1002_v26 = vld [vmem:[%s1163_s17] sm:$0xff] (!%p810_p13)   ;;  %v1004_v28 = vld [vmem:[%s1163_s17 + $0x10] sm:$0xff] (!%p810_p13)   ;;  %v1005_v29 = vld [vmem:[%s1163_s17 + $0x18] sm:$0xff] (!%p810_p13)  }
  0xc7   : > { %893 = vmatprep.subr.bf16.mxu0 (!%p810_p13), %v1084_v9  ;;  %v1006_v30 = vld [vmem:[%s1163_s17 + $0x20] sm:$0xff] (!%p810_p13)   ;;  %v1007_v31 = vld [vmem:[%s1163_s17 + $0x28] sm:$0xff] (!%p810_p13)   ;;  %v1008_v32 = vld [vmem:[%s1163_s17 + $0x30] sm:$0xff] (!%p810_p13)  }
  0xc8   : > { %912 = vmatpush3.bf16.msra.mxu1 %v995_v13  ;;  %v1009_v33 = vld [vmem:[%s1163_s17 + $0x38] sm:$0xff]   ;;  %v666_v34 = vld [vmem:[#allocation3] sm:$0xff]  ;;  %v665_v53 = vld [vmem:[#allocation2] sm:$0xff] }
  0xc9   : > { %913 = vmatprep.subr.bf16.mxu1 %v1084_v9  ;;  %669 = vperm.xlu0 %985, %v666_v34  }
  0xca   : > { %894 = vmatpush3.bf16.msra.mxu0 %v988_v11 }
  0xcb   : > { %895 = vmatprep.subr.bf16.mxu0 %v1084_v9 }
  0xcc   : > { %914 = vmatpush3.bf16.msra.mxu1 %v996_v15 }
  0xcd   : > { %915 = vmatprep.subr.bf16.mxu1 %v1084_v9 }
  0xce   : > { %896 = vmatpush3.bf16.msra.mxu0 %v989_v14 }
  0xcf   : > { %897 = vmatprep.subr.bf16.mxu0 %v1084_v9 }
  0xd0   : > { %916 = vmatpush3.bf16.msra.mxu1 %v997_v18 }
  0xd1   : > { %917 = vmatprep.subr.bf16.mxu1 %v1084_v9 }
  0xd2   : > { %898 = vmatpush3.bf16.msra.mxu0 %v990_v16 }
  0xd3   : > { %899 = vmatprep.subr.bf16.mxu0 %v1084_v9 }
  0xd4   : > { %918 = vmatpush3.bf16.msra.mxu1 %v998_v19 }
  0xd5   : > { %919 = vmatprep.subr.bf16.mxu1 %v1084_v9 }
  0xd6   : > { %900 = vmatpush3.bf16.msra.mxu0 %v991_v17 }
  0xd7   : > { %901 = vmatprep.subr.bf16.mxu0 %v1084_v9 }
  0xd8   : > { %920 = vmatpush3.bf16.msra.mxu1 %v999_v21 }
  0xd9   : > { %921 = vmatprep.subr.bf16.mxu1 %v1084_v9 }
  0xda   : > { %902 = vmatpush3.bf16.msra.mxu0 %v992_v20 }
  0xdb   : > { %903 = vmatprep.subr.bf16.mxu0 %v1084_v9 }
  0xdc   : > { %922 = vmatpush3.bf16.msra.mxu1 %v1000_v23 }
  0xdd   : > { %923 = vmatprep.subr.bf16.mxu1 %v1084_v9 }
  0xde   : > { %904 = vmatpush3.bf16.msra.mxu0 %v994_v22 }
  0xdf   : > { %929 = vmatprep.subr.bf16.mxu0 %v1084_v9 }
  0xe0   : > { %924 = vmatpush3.bf16.msra.mxu1 %v1001_v25 }
  0xe1   : > { %906 = vmatmul.mubr.bf16.vlgmr.msra.gmra.mrb[0].mxu0 %v342_v24 }
  0xe2   : > { %945 = vmatprep.mubr.msk.bf16.mxu0 %vm1085_vm3, %v1084_v9  ;;  %930 = vmatpush3.bf16.msra.mxu0 %v1002_v26 }
  0xe3   : > { %926 = vmatmul.mubr.bf16.vlgmr.msra.gmra.mrb[0].mxu1 %v342_v24  ;;  %931 = vmatprep.subr.bf16.mxu0 %v1084_v9 }
  0xe6   : > { %932 = vmatpush3.bf16.msra.mxu0 %v1003_v27 }
  0xe7   : > { %933 = vmatprep.subr.bf16.mxu0 %v1084_v9 }
  0xea   : > { %934 = vmatpush3.bf16.msra.mxu0 %v1004_v28 }
  0xeb   : > { %935 = vmatprep.subr.bf16.mxu0 %v1084_v9 }
  0xee   : > { %936 = vmatpush3.bf16.msra.mxu0 %v1005_v29 }
  0xef   : > { %937 = vmatprep.subr.bf16.mxu0 %v1084_v9 }
  0xf2   : > { %938 = vmatpush3.bf16.msra.mxu0 %v1006_v30 }
  0xf3   : > { %939 = vmatprep.subr.bf16.mxu0 %v1084_v9 }
  0xf6   : > { %940 = vmatpush3.bf16.msra.mxu0 %v1007_v31 }
  0xf7   : > { %941 = vmatprep.subr.bf16.mxu0 %v1084_v9 }
  0xfa   : > { %942 = vmatpush3.bf16.msra.mxu0 %v1008_v32 }
  0xfb   : > { %943 = vmatprep.subr.bf16.mxu0 %v1084_v9 }
  0xfe   : > { %944 = vmatpush3.bf16.msra.mxu0 %v1009_v33 }
 0x148   : > { %v670_v51 = vpop.permute.xlu0 %669 }
 0x1b4   : > { %v441_v36 = vpop.f32.mrb[0].mxu0 }
 0x1b5   : > { %v843_v37 = vmul.f32 -1.442695, %v441_v36  ;;  %v907_v38 = vpop.f32.mrb[1].mxu0 }
 0x1b6   : > { %v444_v39 = vpop.f32.mrb[2].mxu0  ;;  %v546_v41 = vpop.f32.mrb[0].mxu1 }
 0x1b7   : > { %1010 = vpow2.f32 %v843_v37  ;;  %v908_v40 = vpop.f32.mrb[3].mxu0  ;;  %v927_v42 = vpop.f32.mrb[1].mxu1 }
 0x1b8   : > { %v549_v43 = vpop.f32.mrb[2].mxu1 }
 0x1b9   : > { %v928_v44 = vpop.f32.mrb[3].mxu1 }
 0x1c1   : > { %v1011_v45 = vpop.eup %1010 }
 0x1c2   : > { %v555_v46 = vadd.f32 1.0, %v1011_v45 }
 0x1c4   : > { %1012 = vrcp.f32 %v555_v46 }
 0x1ce   : > { %v1013_v47 = vpop.eup %1012 }
 0x1cf   : > { %v558_v48 = vmul.f32 %v1013_v47, %v441_v36 }
 0x1d1   : > { %v559_v49 = vmul.f32 %v558_v48, %v546_v41 }
 0x1d3   : > { %v560_v50 = vpack.c.bf16 %v559_v49, %v559_v49 }
 0x1d5   : > { %946 = vmatmul.mubr.bf16.vlgmr.msra.gmra.mrb[4].mxu0 %v560_v50 }
 0x2a8   : > { %v659_v52 = vpop.f32.mrb[4].mxu0 }
 0x2a9   : > { %v672_v54 = vmul.f32 %v670_v51, %v659_v52  ;;  %v947_v55 = vpop.f32.mrb[5].mxu0 }
 0x2aa   : > { %v662_v56 = vpop.f32.mrb[6].mxu0 }
 0x2ab   : > { %v673_v57 = vadd.f32 %v672_v54, %v665_v53  ;;  %v948_v58 = vpop.f32.mrb[7].mxu0 }
 0x2ad   : > { %674 = vst [vmem:[#allocation2] sm:$0xff] %v673_v57 }
 0x2ae PF: > { %p675_p0 = scmp.eq.s32.totalorder %s1072_s28, 8 }
 0x2b0   : > { %679 = sbr.rel (!%p675_p0) target bundleno = 695 (0x2b7), region = 52 }
 0x2b4   : > { %v680_v59 = vld [vmem:[#allocation2] sm:$0xff] (%p675_p0) }
 0x2b5   : > { %681 = vst [vmem:[#allocation7] sm:$0xff] (%p675_p0), %v680_v59 }
 0x2b7 PF: > { %p1233_p1 = scmp.eq.s32.totalorder %s798_s1, 8  ;;  %s1087_s24 = smov [#allocation7]  }
 0x2b8   : > { %s691_s25 = sshll.u32 %s1087_s24, 4  ;;  %s692_s25 = int_to_ptr.vmem [resolvable:$true] %s691_s25 }
 0x2b9   : > { %s1026_s26 = scalar_lea.vmem %s692_s25, 128  ;;  %p1033_p5 = scmp.lt.s32.totalorder %s692_s25, %s692_s25 }
 0x2ba   : > { %p1027_p2 = scmp.ne.s32.totalorder %s692_s25, %s1026_s26  ;;  %p1034_p6 = scmp.lt.s32.totalorder %s1026_s26, %s1026_s26 }
 0x2bc   : > { %p1028_p3 = pnand %p1027_p2, %p1233_p1  ;;  %p1035_p7 = por %p1034_p6, %p1033_p5 }
 0x2be   : > { %p1029_p4 = pneg %p1028_p3 }
 0x2c0   : > { %p1036_p8 = pnand %p1035_p7, %p1029_p4 }
 0x2c2   : > { %1039 = shalt.err (!%p1036_p8)
}
 0x2c3   : > { %s1040_s1 = scalar_lea.hbm %s1274_s6, 128 }
 0x2c4   : > { %p1041_p9 = scmp.ne.s32.totalorder %s1274_s6, %s1040_s1  ;;  %p1046_p12 = scmp.lt.u32.totalorder %s1040_s1, %s1274_s6 }
 0x2c6   : > { %p1042_p10 = pnand %p1041_p9, %p1233_p1 }
 0x2c8   : > { %p1043_p11 = pneg %p1042_p10 }
 0x2ca   : > { %p1048_p13 = pnand %p1046_p12, %p1043_p11 }
 0x2cc   : > { %1051 = shalt.err (!%p1048_p13)
}
 0x2cd   : > { %950 = dma.vmem_to_hbm [thread:$0]  (%p1233_p1), %s692_s25, 128, %s1274_s6, [#allocation8]  }
 0x2ce   : > { %1067 = dma.done.wait (%p1233_p1), [#allocation8], 128  }
 0x2cf   : > { %1069 = vsyncadd (%p1233_p1), [#allocation8], 4294967168 }
 0x2d0 PF: > { %s24_s29 = sadd.s32 1, %s1080_s29   ;;  %s1276_s28 = smov %s1076_s0 }
 0x2d1   : > { %p21_p0 = scmp.ge.s32.totalorder %s24_s29, 11   ;;  %s1277_s0 = smov %s1279_s30 }
 0x2d3   :  { %23 = sbr.rel (!%p21_p0) target bundleno = 17 (0x11), region = 90 }
 0x2da   :  { %704 = vsyncpa [#allocation8], 1 }
 0x2db   :  { %706 = vsyncpa [#allocation8 + $0x1], 1 }

</bundles_post_ra>
